<compile_context>
chip_gen: v7x
topology: tpu7x:2x2x1
jax: 0.10.0
libtpu: 0.0.40
codegen_flags: <defaults>
</compile_context>

<pallas_src>
import functools

import jax
import jax.numpy as jnp
from jax import lax
from jax.experimental import pallas as pl
from jax.experimental.pallas import tpu as pltpu


# Above this token count the n x n triangular-matmul operand is dropped in favour of a
# roll-based scan (keeps VMEM bounded on v7x's 64 MiB and scales to production n).
_SCAN_MIN_TOKENS = 1024


def _exclusive_cumsum_lanes(x):
    """Exclusive cumsum along the last (lane) axis.

    Hillis-Steele scan: log2(n) `pltpu.roll` (XLU slot) + masked adds (VPU). No n x n
    operand, O(rows * n * log n) work. Values are 0/1 counts so f32 accumulation is exact.
    """
    n = x.shape[-1]
    lane = lax.broadcasted_iota(jnp.int32, x.shape, x.ndim - 1)
    acc = x
    shift = 1
    while shift < n:
        rolled = pltpu.roll(acc, shift=shift, axis=x.ndim - 1)
        acc = acc + jnp.where(lane >= shift, rolled, 0.0)
        shift *= 2
    return acc - x


def top2_gating_kernel(x_ref, w_ref, probs_ref, *refs,
                       eps, inv_threshold, capacity, use_tri):
    # Per-group block, tokens on the 128-wide lane axis for all hot compute:
    #   x_ref:     (d, n)
    #   w_ref:     (d, e)        resident (constant index_map)
    #   probs_ref: (1, n)
    #   tri_ref:   (n, n) bf16   resident, only when use_tri
    #   dispatch_ref / combine_ref: (n, e, capacity)   -- reference layout, written once
    #   loss_ref:  (1, 1)        per-group partial loss
    if use_tri:
        tri_ref, dispatch_ref, combine_ref, loss_ref = refs
    else:
        tri_ref = None
        dispatch_ref, combine_ref, loss_ref = refs

    x = x_ref[...].astype(jnp.float32)                               # (d, n)
    w = w_ref[...].astype(jnp.float32)                               # (d, e)
    d, n = x.shape
    e = w.shape[1]

    # logits[j, t] = sum_k w[k, j] * x[k, t] -> (e, n).
    # d*e is tiny here (25): broadcast FMAs on full (e, n) vregs beat an MXU push.
    # Gate on size: fall back to the MXU if the gating feature dim ever grows.
    if d * e <= 256:
        logits = jnp.sum(w[:, :, None] * x[:, None, :], axis=0)      # (e, n)
    else:
        logits = lax.dot_general(w, x, (((0,), (0,)), ((), ())),
                                 preferred_element_type=jnp.float32)

    # softmax over the expert (sublane) axis -- exact division (correctness feedback)
    logits = logits - jnp.max(logits, axis=0, keepdims=True)
    ex = jnp.exp(logits)
    raw = ex / jnp.sum(ex, axis=0, keepdims=True)                    # (e, n)

    iota_e = lax.broadcasted_iota(jnp.int32, (e, n), 0)

    # top-1 (argmax via max + first-match iota; ties are measure-zero for real inputs)
    gate_1 = jnp.max(raw, axis=0, keepdims=True)                     # (1, n)
    index_1 = jnp.min(jnp.where(raw == gate_1, iota_e, e), axis=0, keepdims=True)
    oh1 = (iota_e == index_1).astype(jnp.float32)                    # (e, n)

    # top-2: mask out the top-1 gate and take the max again
    gates_wo = raw * (1.0 - oh1)
    gate_2 = jnp.max(gates_wo, axis=0, keepdims=True)
    index_2 = jnp.min(jnp.where(gates_wo == gate_2, iota_e, e), axis=0, keepdims=True)
    oh2 = (iota_e == index_2).astype(jnp.float32)

    denom = gate_1 + gate_2 + eps
    gate_1 = gate_1 / denom
    gate_2 = gate_2 / denom

    # load-balancing loss partial for this group: sum_e(mean_n(raw) * mean_n(mask_1))
    density_1 = jnp.mean(oh1, axis=1, keepdims=True)                 # (e, 1)
    density_proxy = jnp.mean(raw, axis=1, keepdims=True)             # (e, 1)
    loss_ref[...] = jnp.sum(density_proxy * density_1, axis=0, keepdims=True)  # (1, 1)

    # second-expert policy == 'random' (train default): keep with prob gate_2 / threshold
    keep2 = (probs_ref[...].astype(jnp.float32)
             < gate_2 * inv_threshold).astype(jnp.float32)           # (1, n)
    mask_1 = oh1
    mask_2 = oh2 * keep2

    cap_f = float(capacity)

    # ---- fused exclusive cumsum over the token (lane) axis ----
    # stacked[j]     = mask_1[j]        for j <  e
    # stacked[e + j] = mask_2[j]        for j >= e   (built without a concatenate)
    iota_2e = lax.broadcasted_iota(jnp.int32, (2 * e, n), 0)
    stacked = ((iota_2e == index_1).astype(jnp.float32)
               + (iota_2e == (index_2 + e)).astype(jnp.float32) * keep2)   # (2e, n)

    if use_tri:
        # one MXU matmul for both cumsums; bf16 operands, f32 accumulation (exact 0/1).
        cum = jnp.dot(stacked.astype(jnp.bfloat16), tri_ref[...],
                      preferred_element_type=jnp.float32)            # (2e, n)
    else:
        # roll-based scan: no n x n operand, scales to production token counts.
        cum = _exclusive_cumsum_lanes(stacked)                       # (2e, n)
    cum1 = cum[:e, :]
    cum2 = cum[e:, :]

    # capacity assignment for expert-1 (matches the reference ordering exactly:
    # positions from the pre-truncation mask, count from the post-truncation mask).
    pos1 = cum1 * mask_1                                             # (e, n)
    mask_1 = mask_1 * (pos1 < cap_f).astype(jnp.float32)
    mask_1_count = jnp.sum(mask_1, axis=1, keepdims=True)            # (e, 1)
    mask_1_flat = jnp.sum(mask_1, axis=0, keepdims=True)             # (1, n)
    pos1_flat = jnp.sum(pos1, axis=0, keepdims=True)                 # (1, n)
    gate_1 = gate_1 * mask_1_flat

    # capacity assignment for expert-2 (offset by expert-1 post-truncation occupancy)
    pos2 = (cum2 + mask_1_count) * mask_2                            # (e, n)
    mask_2 = mask_2 * (pos2 < cap_f).astype(jnp.float32)
    mask_2_flat = jnp.sum(mask_2, axis=0, keepdims=True)             # (1, n)
    pos2_flat = jnp.sum(pos2, axis=0, keepdims=True)                 # (1, n)
    gate_2 = gate_2 * mask_2_flat

    # ---- build combine/dispatch directly in the reference (n, e, capacity) layout ----
    # Only a few tiny per-token rows need relayout (tokens lanes -> sublanes); the big
    # (n, e, cap) product is then built and stored once, with no wrapper transpose.
    g1oh1 = gate_1 * oh1                                             # (e, n)
    g2oh2 = gate_2 * oh2                                             # (e, n)
    g1oh1_t = jnp.transpose(g1oh1, (1, 0))                           # (n, e)
    g2oh2_t = jnp.transpose(g2oh2, (1, 0))                           # (n, e)
    pos1_t = jnp.transpose(pos1_flat, (1, 0)).astype(jnp.int32)      # (n, 1)
    pos2_t = jnp.transpose(pos2_flat, (1, 0)).astype(jnp.int32)      # (n, 1)

    # safe_one_hot over capacity slots (positions >= capacity -> all-zero row)
    iota_c = lax.broadcasted_iota(jnp.int32, (n, capacity), 1)
    poc1 = (pos1_t == iota_c).astype(jnp.float32)                    # (n, cap)
    poc2 = (pos2_t == iota_c).astype(jnp.float32)                    # (n, cap)

    # gate_1/gate_2 already carry mask_*_flat; the reference's extra mask_*_flat factor
    # (values in {0,1}) is redundant and dropped.
    combine = (g1oh1_t[:, :, None] * poc1[:, None, :]
               + g2oh2_t[:, :, None] * poc2[:, None, :])             # (n, e, cap)

    combine_ref[...] = combine.astype(combine_ref.dtype)
    # dispatch = combine.bool().to(float) exactly as in the reference forward.
    dispatch_ref[...] = (combine != 0.0).astype(dispatch_ref.dtype)


def top2_gating(x, w_gating, probs, *, num_gates=5, eps=1e-9,
                second_threshold=0.2, capacity_factor=1.25,
                dispatch_dtype=jnp.float32, combine_dtype=jnp.float32):
    b, n, d = x.shape
    e = num_gates
    expert_capacity = min(n, int(n * capacity_factor / e))
    expert_capacity = max(expert_capacity, 3)
    cap = expert_capacity

    # Token axis on lanes inside the kernel. x is tiny on the feature dim (d=5), so this
    # wrapper transpose is negligible; probs reshape is metadata-only. No dtype pre-cast:
    # inputs go in at native dtype, the f32 cast happens in-kernel.
    x_t = jnp.transpose(x, (0, 2, 1))                                # (b, d, n)
    probs_t = probs.reshape(b, 1, n)                                 # (b, 1, n)
    w = w_gating                                                     # (d, e)

    use_tri = n < _SCAN_MIN_TOKENS

    kernel = functools.partial(
        top2_gating_kernel,
        eps=float(eps),
        inv_threshold=1.0 / max(second_threshold, eps),
        capacity=cap,
        use_tri=use_tri,
    )

    out_shapes = (
        jax.ShapeDtypeStruct((b, n, e, cap), dispatch_dtype),        # dispatch (ref layout)
        jax.ShapeDtypeStruct((b, n, e, cap), combine_dtype),         # combine  (ref layout)
        jax.ShapeDtypeStruct((b, 1, 1), jnp.float32),                # per-group loss partial
    )
    in_specs = [
        pl.BlockSpec((None, d, n), lambda i: (i, 0, 0)),             # x_t
        pl.BlockSpec((d, e), lambda i: (0, 0)),                      # w (resident)
        pl.BlockSpec((None, 1, n), lambda i: (i, 0, 0)),             # probs
    ]
    inputs = [x_t, w, probs_t]
    if use_tri:
        # Strictly-upper-triangular operand, built once at trace time, resident in VMEM
        # (constant index_map -> DMA'd once), bf16 (0/1 exact, half the footprint).
        row = lax.broadcasted_iota(jnp.int32, (n, n), 0)
        col = lax.broadcasted_iota(jnp.int32, (n, n), 1)
        tri = (row < col).astype(jnp.bfloat16)                       # tri[j, t] = 1 iff j < t
        inputs.append(tri)
        in_specs.append(pl.BlockSpec((n, n), lambda i: (0, 0)))

    out_specs = (
        pl.BlockSpec((None, n, e, cap), lambda i: (i, 0, 0, 0)),
        pl.BlockSpec((None, n, e, cap), lambda i: (i, 0, 0, 0)),
        pl.BlockSpec((None, 1, 1), lambda i: (i, 0, 0)),
    )

    # Per-step VMEM budget: double-buffered outputs + inputs + in-kernel temporaries
    # (+ resident tri), using (8,128)-padded sizes; clamped to a chip-safe [32, 64] MiB.
    e_pad = ((e + 7) // 8) * 8
    cap_pad = ((cap + 127) // 128) * 128
    n_pad = ((n + 127) // 128) * 128
    out_block = n * e_pad * cap_pad * 4
    vmem = 2 * 2 * out_block                       # dispatch + combine, double-buffered
    vmem += 4 * out_block                          # combine/dispatch build temporaries
    vmem += 2 * 2 * 8 * n_pad * 4                  # x + probs blocks, double-buffered
    vmem += 32 * n_pad * 4                         # (e,n)/(2e,n) masks, gates, cumsums
    if use_tri:
        vmem += 2 * n_pad * n_pad * 2              # resident bf16 tri (+slack)
    vmem_limit_bytes = int(min(max(vmem + (2 << 20), 32 << 20), 64 << 20))

    # TODO(synk): for production token counts, also tile the token axis (inner
    # "arbitrary" grid axis with cumsum/count carries) so each core gets many pipelined
    # steps on v7x and the per-step output blocks stay well under 64 MiB.
    dispatch, combine, loss_part = pl.pallas_call(
        kernel,
        grid=(b,),
        out_shape=out_shapes,
        in_specs=in_specs,
        out_specs=out_specs,
        compiler_params=pltpu.CompilerParams(
            dimension_semantics=("parallel",),
            vmem_limit_bytes=vmem_limit_bytes),
    )(*inputs)

    # Finish the scalar loss reduction: mean over (b, e) times num_gates**2 == sum * e / b.
    loss = jnp.sum(loss_part) * (float(e) / float(b))
    return dispatch, combine, loss


if __name__ == "__main__":
    key = jax.random.PRNGKey(0)
    kx, kw, kp = jax.random.split(key, 3)

    # Small shapes consistent with the module: w_gating is (5, num_gates) so the gating
    # feature dim is 5; num_gates = 5; 2 groups of 16 tokens each -> expert_capacity = 4.
    b, n, d, e = 2, 16, 5, 5
    x = jax.random.normal(kx, (b, n, d), dtype=jnp.float32)
    w_gating = jax.random.normal(kw, (d, e), dtype=jnp.float32)      # ~ torch.randn(5, num_gates)

    # TODO(synk): `policy`, `threshold`, `capacity_factor` are undefined names in the
    # reference forward; we assume the training defaults (policy='random', threshold=0.2,
    # capacity_factor=1.25) and draw the policy uniforms deterministically outside the kernel.
    probs = jax.random.uniform(kp, (b, n), dtype=jnp.float32)

    dispatch, combine, loss = top2_gating(x, w_gating, probs, num_gates=e)
    jax.block_until_ready((dispatch, combine, loss))
    print("KERNEL_OK")
</pallas_src>

<mosaic_0001>
module attributes {stable_mosaic.version = 11 : i64} {
  func.func @top2_gating_kernel(%arg0: i32, %arg1: memref<1x5x16xf32, #tpu.memory_space<vmem>>, %arg2: memref<5x5xf32, #tpu.memory_space<vmem>>, %arg3: memref<1x1x16xf32, #tpu.memory_space<vmem>>, %arg4: memref<16x16xbf16, #tpu.memory_space<vmem>>, %arg5: memref<1x16x5x4xf32, #tpu.memory_space<vmem>>, %arg6: memref<1x16x5x4xf32, #tpu.memory_space<vmem>>, %arg7: memref<1x1x1xf32, #tpu.memory_space<vmem>>) attributes {dimension_semantics = [#tpu.dimension_semantics<parallel>], iteration_bounds = array<i64: 2>, scalar_prefetch = 0 : i64, scratch_operands = 0 : i64, tpu.core_type = #tpu.core_type<tc>, window_params = [{transform_indices = @transform_0, window_bounds = array<i64: 1, 5, 16>}, {pipeline_mode = #tpu.pipeline_mode<synchronous>, transform_indices = @transform_1, window_bounds = array<i64: 5, 5>}, {transform_indices = @transform_2, window_bounds = array<i64: 1, 1, 16>}, {pipeline_mode = #tpu.pipeline_mode<synchronous>, transform_indices = @transform_3, window_bounds = array<i64: 16, 16>}, {transform_indices = @transform_4, window_bounds = array<i64: 1, 16, 5, 4>}, {transform_indices = @transform_5, window_bounds = array<i64: 1, 16, 5, 4>}, {transform_indices = @transform_6, window_bounds = array<i64: 1, 1, 1>}]} {
    %c0 = arith.constant 0 : index
    %c0_0 = arith.constant 0 : index
    %c0_1 = arith.constant 0 : index
    %0 = vector.load %arg1[%c0, %c0_0, %c0_1] : memref<1x5x16xf32, #tpu.memory_space<vmem>>, vector<1x5x16xf32>
    %1 = vector.shape_cast %0 : vector<1x5x16xf32> to vector<5x16xf32>
    %c0_2 = arith.constant 0 : index
    %c0_3 = arith.constant 0 : index
    %2 = vector.load %arg2[%c0_2, %c0_3] : memref<5x5xf32, #tpu.memory_space<vmem>>, vector<5x5xf32>
    %3 = vector.shape_cast %2 : vector<5x5xf32> to vector<5x5x1xf32>
    %4 = vector.shape_cast %1 : vector<5x16xf32> to vector<5x1x16xf32>
    %5 = vector.broadcast %3 : vector<5x5x1xf32> to vector<5x5x16xf32>
    %6 = vector.broadcast %4 : vector<5x1x16xf32> to vector<5x5x16xf32>
    %7 = arith.mulf %5, %6 : vector<5x5x16xf32>
    %cst = arith.constant dense<0.000000e+00> : vector<5x16xf32>
    %8 = vector.multi_reduction <add>, %7, %cst [0] : vector<5x5x16xf32> to vector<5x16xf32>
    %cst_4 = arith.constant dense<0xFF800000> : vector<16xf32>
    %9 = vector.multi_reduction <maximumf>, %8, %cst_4 [0] : vector<5x16xf32> to vector<16xf32>
    %10 = vector.shape_cast %9 : vector<16xf32> to vector<1x16xf32>
    %11 = vector.broadcast %10 : vector<1x16xf32> to vector<5x16xf32>
    %12 = arith.subf %8, %11 : vector<5x16xf32>
    %13 = math.exp %12 : vector<5x16xf32>
    %cst_5 = arith.constant dense<0.000000e+00> : vector<16xf32>
    %14 = vector.multi_reduction <add>, %13, %cst_5 [0] : vector<5x16xf32> to vector<16xf32>
    %15 = vector.shape_cast %14 : vector<16xf32> to vector<1x16xf32>
    %16 = vector.broadcast %15 : vector<1x16xf32> to vector<5x16xf32>
    %17 = arith.divf %13, %16 : vector<5x16xf32>
    %18 = tpu.iota {dimensions = array<i32: 0>} : vector<5x16xi32>
    %cst_6 = arith.constant dense<0xFF800000> : vector<16xf32>
    %19 = vector.multi_reduction <maximumf>, %17, %cst_6 [0] : vector<5x16xf32> to vector<16xf32>
    %20 = vector.shape_cast %19 : vector<16xf32> to vector<1x16xf32>
    %21 = vector.broadcast %20 : vector<1x16xf32> to vector<5x16xf32>
    %22 = arith.cmpf oeq, %17, %21 : vector<5x16xf32>
    %c5_i32 = arith.constant 5 : i32
    %23 = vector.broadcast %c5_i32 : i32 to vector<5x16xi32>
    %24 = arith.select %22, %18, %23 : vector<5x16xi1>, vector<5x16xi32>
    %cst_7 = arith.constant dense<2147483647> : vector<16xi32>
    %25 = vector.multi_reduction <minsi>, %24, %cst_7 [0] : vector<5x16xi32> to vector<16xi32>
    %26 = vector.shape_cast %25 : vector<16xi32> to vector<1x16xi32>
    %27 = vector.broadcast %26 : vector<1x16xi32> to vector<5x16xi32>
    %28 = arith.cmpi eq, %18, %27 : vector<5x16xi32>
    %29 = arith.extui %28 : vector<5x16xi1> to vector<5x16xi32>
    %30 = arith.sitofp %29 : vector<5x16xi32> to vector<5x16xf32>
    %cst_8 = arith.constant 1.000000e+00 : f32
    %31 = vector.broadcast %cst_8 : f32 to vector<5x16xf32>
    %32 = arith.subf %31, %30 : vector<5x16xf32>
    %33 = arith.mulf %17, %32 : vector<5x16xf32>
    %cst_9 = arith.constant dense<0xFF800000> : vector<16xf32>
    %34 = vector.multi_reduction <maximumf>, %33, %cst_9 [0] : vector<5x16xf32> to vector<16xf32>
    %35 = vector.shape_cast %34 : vector<16xf32> to vector<1x16xf32>
    %36 = vector.broadcast %35 : vector<1x16xf32> to vector<5x16xf32>
    %37 = arith.cmpf oeq, %33, %36 : vector<5x16xf32>
    %c5_i32_10 = arith.constant 5 : i32
    %38 = vector.broadcast %c5_i32_10 : i32 to vector<5x16xi32>
    %39 = arith.select %37, %18, %38 : vector<5x16xi1>, vector<5x16xi32>
    %cst_11 = arith.constant dense<2147483647> : vector<16xi32>
    %40 = vector.multi_reduction <minsi>, %39, %cst_11 [0] : vector<5x16xi32> to vector<16xi32>
    %41 = vector.shape_cast %40 : vector<16xi32> to vector<1x16xi32>
    %42 = vector.broadcast %41 : vector<1x16xi32> to vector<5x16xi32>
    %43 = arith.cmpi eq, %18, %42 : vector<5x16xi32>
    %44 = arith.extui %43 : vector<5x16xi1> to vector<5x16xi32>
    %45 = arith.sitofp %44 : vector<5x16xi32> to vector<5x16xf32>
    %46 = arith.addf %20, %35 : vector<1x16xf32>
    %cst_12 = arith.constant 9.99999971E-10 : f32
    %47 = vector.broadcast %cst_12 : f32 to vector<1x16xf32>
    %48 = arith.addf %46, %47 : vector<1x16xf32>
    %49 = arith.divf %20, %48 : vector<1x16xf32>
    %50 = arith.divf %35, %48 : vector<1x16xf32>
    %cst_13 = arith.constant dense<0.000000e+00> : vector<5xf32>
    %51 = vector.multi_reduction <add>, %30, %cst_13 [1] : vector<5x16xf32> to vector<5xf32>
    %52 = vector.shape_cast %51 : vector<5xf32> to vector<5x1xf32>
    %cst_14 = arith.constant 1.600000e+01 : f32
    %53 = vector.broadcast %cst_14 : f32 to vector<5x1xf32>
    %54 = arith.divf %52, %53 : vector<5x1xf32>
    %cst_15 = arith.constant dense<0.000000e+00> : vector<5xf32>
    %55 = vector.multi_reduction <add>, %17, %cst_15 [1] : vector<5x16xf32> to vector<5xf32>
    %56 = vector.shape_cast %55 : vector<5xf32> to vector<5x1xf32>
    %cst_16 = arith.constant 1.600000e+01 : f32
    %57 = vector.broadcast %cst_16 : f32 to vector<5x1xf32>
    %58 = arith.divf %56, %57 : vector<5x1xf32>
    %59 = arith.mulf %58, %54 : vector<5x1xf32>
    %cst_17 = arith.constant dense<0.000000e+00> : vector<1xf32>
    %60 = vector.multi_reduction <add>, %59, %cst_17 [0] : vector<5x1xf32> to vector<1xf32>
    %61 = vector.shape_cast %60 : vector<1xf32> to vector<1x1xf32>
    %c0_18 = arith.constant 0 : index
    %c0_19 = arith.constant 0 : index
    %c0_20 = arith.constant 0 : index
    %62 = vector.load %arg7[%c0_18, %c0_19, %c0_20] : memref<1x1x1xf32, #tpu.memory_space<vmem>>, vector<1x1x1xf32>
    %63 = vector.shape_cast %62 : vector<1x1x1xf32> to vector<1x1xf32>
    %64 = vector.shape_cast %61 : vector<1x1xf32> to vector<1x1x1xf32>
    tpu.vector_store %arg7[%c0_18, %c0_19, %c0_20], %64 {strides = array<i32>} : memref<1x1x1xf32, #tpu.memory_space<vmem>>, vector<1x1x1xf32>,
    %c0_21 = arith.constant 0 : index
    %c0_22 = arith.constant 0 : index
    %c0_23 = arith.constant 0 : index
    %65 = vector.load %arg3[%c0_21, %c0_22, %c0_23] : memref<1x1x16xf32, #tpu.memory_space<vmem>>, vector<1x1x16xf32>
    %66 = vector.shape_cast %65 : vector<1x1x16xf32> to vector<1x16xf32>
    %cst_24 = arith.constant 5.000000e+00 : f32
    %67 = vector.broadcast %cst_24 : f32 to vector<1x16xf32>
    %68 = arith.mulf %50, %67 : vector<1x16xf32>
    %69 = arith.cmpf olt, %66, %68 : vector<1x16xf32>
    %70 = arith.extui %69 : vector<1x16xi1> to vector<1x16xi32>
    %71 = arith.sitofp %70 : vector<1x16xi32> to vector<1x16xf32>
    %72 = vector.broadcast %71 : vector<1x16xf32> to vector<5x16xf32>
    %73 = arith.mulf %45, %72 : vector<5x16xf32>
    %74 = tpu.iota {dimensions = array<i32: 0>} : vector<10x16xi32>
    %75 = vector.broadcast %26 : vector<1x16xi32> to vector<10x16xi32>
    %76 = arith.cmpi eq, %74, %75 : vector<10x16xi32>
    %77 = arith.extui %76 : vector<10x16xi1> to vector<10x16xi32>
    %78 = arith.sitofp %77 : vector<10x16xi32> to vector<10x16xf32>
    %c5_i32_25 = arith.constant 5 : i32
    %79 = vector.broadcast %c5_i32_25 : i32 to vector<1x16xi32>
    %80 = arith.addi %41, %79 : vector<1x16xi32>
    %81 = vector.broadcast %80 : vector<1x16xi32> to vector<10x16xi32>
    %82 = arith.cmpi eq, %74, %81 : vector<10x16xi32>
    %83 = arith.extui %82 : vector<10x16xi1> to vector<10x16xi32>
    %84 = arith.sitofp %83 : vector<10x16xi32> to vector<10x16xf32>
    %85 = vector.broadcast %71 : vector<1x16xf32> to vector<10x16xf32>
    %86 = arith.mulf %84, %85 : vector<10x16xf32>
    %87 = arith.addf %78, %86 : vector<10x16xf32>
    %88 = arith.truncf %87 : vector<10x16xf32> to vector<10x16xbf16>
    %c0_26 = arith.constant 0 : index
    %c0_27 = arith.constant 0 : index
    %89 = vector.load %arg4[%c0_26, %c0_27] : memref<16x16xbf16, #tpu.memory_space<vmem>>, vector<16x16xbf16>
    %cst_28 = arith.constant dense<0.000000e+00> : vector<10x16xf32>
    %90 = tpu.matmul %88, %89, %cst_28 {dimension_numbers = #tpu.dot_dimension_numbers<[1], [0], [0], [1], [0, 0, 1, 1], [], []>} : vector<10x16xbf16>, vector<16x16xbf16>, vector<10x16xf32> -> vector<10x16xf32>
    %91 = vector.extract_strided_slice %90 {offsets = [0, 0], sizes = [5, 16], strides = [1, 1]} : vector<10x16xf32> to vector<5x16xf32>
    %92 = vector.extract_strided_slice %90 {offsets = [5, 0], sizes = [5, 16], strides = [1, 1]} : vector<10x16xf32> to vector<5x16xf32>
    %93 = arith.mulf %91, %30 : vector<5x16xf32>
    %cst_29 = arith.constant 4.000000e+00 : f32
    %94 = vector.broadcast %cst_29 : f32 to vector<5x16xf32>
    %95 = arith.cmpf olt, %93, %94 : vector<5x16xf32>
    %96 = arith.extui %95 : vector<5x16xi1> to vector<5x16xi32>
    %97 = arith.sitofp %96 : vector<5x16xi32> to vector<5x16xf32>
    %98 = arith.mulf %30, %97 : vector<5x16xf32>
    %cst_30 = arith.constant dense<0.000000e+00> : vector<5xf32>
    %99 = vector.multi_reduction <add>, %98, %cst_30 [1] : vector<5x16xf32> to vector<5xf32>
    %100 = vector.shape_cast %99 : vector<5xf32> to vector<5x1xf32>
    %cst_31 = arith.constant dense<0.000000e+00> : vector<16xf32>
    %101 = vector.multi_reduction <add>, %98, %cst_31 [0] : vector<5x16xf32> to vector<16xf32>
    %102 = vector.shape_cast %101 : vector<16xf32> to vector<1x16xf32>
    %cst_32 = arith.constant dense<0.000000e+00> : vector<16xf32>
    %103 = vector.multi_reduction <add>, %93, %cst_32 [0] : vector<5x16xf32> to vector<16xf32>
    %104 = vector.shape_cast %103 : vector<16xf32> to vector<1x16xf32>
    %105 = arith.mulf %49, %102 : vector<1x16xf32>
    %106 = vector.broadcast %100 : vector<5x1xf32> to vector<5x16xf32>
    %107 = arith.addf %92, %106 : vector<5x16xf32>
    %108 = arith.mulf %107, %73 : vector<5x16xf32>
    %cst_33 = arith.constant 4.000000e+00 : f32
    %109 = vector.broadcast %cst_33 : f32 to vector<5x16xf32>
    %110 = arith.cmpf olt, %108, %109 : vector<5x16xf32>
    %111 = arith.extui %110 : vector<5x16xi1> to vector<5x16xi32>
    %112 = arith.sitofp %111 : vector<5x16xi32> to vector<5x16xf32>
    %113 = arith.mulf %73, %112 : vector<5x16xf32>
    %cst_34 = arith.constant dense<0.000000e+00> : vector<16xf32>
    %114 = vector.multi_reduction <add>, %113, %cst_34 [0] : vector<5x16xf32> to vector<16xf32>
    %115 = vector.shape_cast %114 : vector<16xf32> to vector<1x16xf32>
    %cst_35 = arith.constant dense<0.000000e+00> : vector<16xf32>
    %116 = vector.multi_reduction <add>, %108, %cst_35 [0] : vector<5x16xf32> to vector<16xf32>
    %117 = vector.shape_cast %116 : vector<16xf32> to vector<1x16xf32>
    %118 = arith.mulf %50, %115 : vector<1x16xf32>
    %119 = vector.broadcast %105 : vector<1x16xf32> to vector<5x16xf32>
    %120 = arith.mulf %119, %30 : vector<5x16xf32>
    %121 = vector.broadcast %118 : vector<1x16xf32> to vector<5x16xf32>
    %122 = arith.mulf %121, %45 : vector<5x16xf32>
    %123 = tpu.transpose %120, [1, 0] : vector<5x16xf32> -> vector<16x5xf32>
    %124 = tpu.transpose %122, [1, 0] : vector<5x16xf32> -> vector<16x5xf32>
    %125 = tpu.transpose %104, [1, 0] : vector<1x16xf32> -> vector<16x1xf32>
    %126 = arith.fptosi %125 : vector<16x1xf32> to vector<16x1xi32>
    %127 = tpu.transpose %117, [1, 0] : vector<1x16xf32> -> vector<16x1xf32>
    %128 = arith.fptosi %127 : vector<16x1xf32> to vector<16x1xi32>
    %129 = tpu.iota {dimensions = array<i32: 1>} : vector<16x4xi32>
    %130 = vector.broadcast %126 : vector<16x1xi32> to vector<16x4xi32>
    %131 = arith.cmpi eq, %130, %129 : vector<16x4xi32>
    %132 = arith.extui %131 : vector<16x4xi1> to vector<16x4xi32>
    %133 = arith.sitofp %132 : vector<16x4xi32> to vector<16x4xf32>
    %134 = vector.broadcast %128 : vector<16x1xi32> to vector<16x4xi32>
    %135 = arith.cmpi eq, %134, %129 : vector<16x4xi32>
    %136 = arith.extui %135 : vector<16x4xi1> to vector<16x4xi32>
    %137 = arith.sitofp %136 : vector<16x4xi32> to vector<16x4xf32>
    %138 = vector.shape_cast %123 : vector<16x5xf32> to vector<16x5x1xf32>
    %139 = vector.shape_cast %133 : vector<16x4xf32> to vector<16x1x4xf32>
    %140 = vector.broadcast %138 : vector<16x5x1xf32> to vector<16x5x4xf32>
    %141 = vector.broadcast %139 : vector<16x1x4xf32> to vector<16x5x4xf32>
    %142 = arith.mulf %140, %141 : vector<16x5x4xf32>
    %143 = vector.shape_cast %124 : vector<16x5xf32> to vector<16x5x1xf32>
    %144 = vector.shape_cast %137 : vector<16x4xf32> to vector<16x1x4xf32>
    %145 = vector.broadcast %143 : vector<16x5x1xf32> to vector<16x5x4xf32>
    %146 = vector.broadcast %144 : vector<16x1x4xf32> to vector<16x5x4xf32>
    %147 = arith.mulf %145, %146 : vector<16x5x4xf32>
    %148 = arith.addf %142, %147 : vector<16x5x4xf32>
    %c0_36 = arith.constant 0 : index
    %c0_37 = arith.constant 0 : index
    %c0_38 = arith.constant 0 : index
    %c0_39 = arith.constant 0 : index
    %149 = vector.load %arg6[%c0_36, %c0_37, %c0_38, %c0_39] : memref<1x16x5x4xf32, #tpu.memory_space<vmem>>, vector<1x16x5x4xf32>
    %150 = vector.shape_cast %149 : vector<1x16x5x4xf32> to vector<16x5x4xf32>
    %151 = vector.shape_cast %148 : vector<16x5x4xf32> to vector<1x16x5x4xf32>
    tpu.vector_store %arg6[%c0_36, %c0_37, %c0_38, %c0_39], %151 {strides = array<i32>} : memref<1x16x5x4xf32, #tpu.memory_space<vmem>>, vector<1x16x5x4xf32>,
    %cst_40 = arith.constant 0.000000e+00 : f32
    %152 = vector.broadcast %cst_40 : f32 to vector<16x5x4xf32>
    %153 = arith.cmpf one, %148, %152 : vector<16x5x4xf32>
    %154 = arith.extui %153 : vector<16x5x4xi1> to vector<16x5x4xi32>
    %155 = arith.sitofp %154 : vector<16x5x4xi32> to vector<16x5x4xf32>
    %c0_41 = arith.constant 0 : index
    %c0_42 = arith.constant 0 : index
    %c0_43 = arith.constant 0 : index
    %c0_44 = arith.constant 0 : index
    %156 = vector.load %arg5[%c0_41, %c0_42, %c0_43, %c0_44] : memref<1x16x5x4xf32, #tpu.memory_space<vmem>>, vector<1x16x5x4xf32>
    %157 = vector.shape_cast %156 : vector<1x16x5x4xf32> to vector<16x5x4xf32>
    %158 = vector.shape_cast %155 : vector<16x5x4xf32> to vector<1x16x5x4xf32>
    tpu.vector_store %arg5[%c0_41, %c0_42, %c0_43, %c0_44], %158 {strides = array<i32>} : memref<1x16x5x4xf32, #tpu.memory_space<vmem>>, vector<1x16x5x4xf32>,
    return
  }
  func.func @transform_0(%arg0: i32) -> (i32, i32, i32) {
    %c0_i32 = arith.constant 0 : i32
    %c0_i32_0 = arith.constant 0 : i32
    %c0_i32_1 = arith.constant 0 : i32
    return %arg0, %c0_i32, %c0_i32_0 : i32, i32, i32
  }
  func.func @transform_1(%arg0: i32) -> (i32, i32) {
    %c0_i32 = arith.constant 0 : i32
    %c0_i32_0 = arith.constant 0 : i32
    %c0_i32_1 = arith.constant 0 : i32
    return %c0_i32, %c0_i32_0 : i32, i32
  }
  func.func @transform_2(%arg0: i32) -> (i32, i32, i32) {
    %c0_i32 = arith.constant 0 : i32
    %c0_i32_0 = arith.constant 0 : i32
    %c0_i32_1 = arith.constant 0 : i32
    return %arg0, %c0_i32, %c0_i32_0 : i32, i32, i32
  }
  func.func @transform_3(%arg0: i32) -> (i32, i32) {
    %c0_i32 = arith.constant 0 : i32
    %c0_i32_0 = arith.constant 0 : i32
    %c0_i32_1 = arith.constant 0 : i32
    return %c0_i32, %c0_i32_0 : i32, i32
  }
  func.func @transform_4(%arg0: i32) -> (i32, i32, i32, i32) {
    %c0_i32 = arith.constant 0 : i32
    %c0_i32_0 = arith.constant 0 : i32
    %c0_i32_1 = arith.constant 0 : i32
    %c0_i32_2 = arith.constant 0 : i32
    return %arg0, %c0_i32, %c0_i32_0, %c0_i32_1 : i32, i32, i32, i32
  }
  func.func @transform_5(%arg0: i32) -> (i32, i32, i32, i32) {
    %c0_i32 = arith.constant 0 : i32
    %c0_i32_0 = arith.constant 0 : i32
    %c0_i32_1 = arith.constant 0 : i32
    %c0_i32_2 = arith.constant 0 : i32
    return %arg0, %c0_i32, %c0_i32_0, %c0_i32_1 : i32, i32, i32, i32
  }
  func.func @transform_6(%arg0: i32) -> (i32, i32, i32) {
    %c0_i32 = arith.constant 0 : i32
    %c0_i32_0 = arith.constant 0 : i32
    %c0_i32_1 = arith.constant 0 : i32
    return %arg0, %c0_i32, %c0_i32_0 : i32, i32, i32
  }
}

</mosaic_0001>

<bundles_post_ra>
// kernel: tpu_custom_call.1
= control target key start
LH: loop header
LB: loop body
LE: loop exit
PB: predicated region body
PF: predicated region fallthrough
CT: control target
= control target key end

     0   :  { %s1767_s21 = smov 0   ;;  %s2149_s0 = inlined_call_operand.vmem [shape: f32[2,5,16], index: 0, kind: input, shape index: {}]   ;;  %s2150_s1 = inlined_call_operand.vmem [shape: f32[5,5], index: 1, kind: input, shape index: {}]   ;;  %s2151_s2 = inlined_call_operand.vmem [shape: f32[2,1,16], index: 2, kind: input, shape index: {}]   ;;  %s2152_s3 = inlined_call_operand.vmem [shape: bf16[16,16], index: 3, kind: input, shape index: {}]   ;;  %s2153_s4 = inlined_call_operand.vmem [shape: f32[2,16,5,4], index: 4, kind: output, shape index: {0}]   ;;  %s2154_s5 = inlined_call_operand.vmem [shape: f32[2,16,5,4], index: 5, kind: output, shape index: {1}]   ;;  %s2155_s6 = inlined_call_operand.vmem [shape: f32[2,1,1], index: 6, kind: output, shape index: {2}]  }
   0x1 LB: > { %s1637_s22 = sadd.s32 4294967295, %s1726_s21   ;;  %p1641_p0 = scmp.ge.s32.totalorder %s1726_s21, 1  ;;  %s1726_s21 = sphi %s1767_s21, %s17_s21  }
   0x2   : > { %p224_p1 = scmp.lt.s32.totalorder %s1726_s21, 3 }
   0x4   : > { %p225_p2 = pnand %p1641_p0, %p224_p1 }
   0x5   : > { %v287_v0 = vlaneseq (!%p225_p2)  ;;  %v286_v2 = vld [vmem:[%s2150_s1] sm:$0x1f] (!%p225_p2)  ;;  %v1728_v13 = vmov (!%p225_p2), 0.0   ;;  %p264_p3 = scmp.lt.s32.totalorder (!%p225_p2), %s1637_s22, 1  ;;  %v1729_v14 = vmov (!%p225_p2), 1966171168  }
   0x6   : > { %228 = sbr.rel (%p225_p2) target bundleno = 1036 (0x40c), region = 36  ;;  %1684 = vmatprep.subr.bf16.mxu0 (!%p225_p2), %v1728_v13  ;;  %v325_v15 = vunpack.c.l.s4 (!%p225_p2), %v1729_v14  ;;  %v1713_v22 = vld [vmem:[%s2152_s3] sm:$0xff] (!%p225_p2)   ;;  %vm1730_vm0 = vmmov (!%p225_p2), 0   ;;  %vm392_vm1 = vcmask (!%p225_p2), 126976  }
   0x7   : > { %v1776_v1 = vshrl.u32 (!%p225_p2), %v287_v0, 7  ;;  %1686 = vmatprep.mubr.msk.bf16.mxu0 (!%p225_p2), %vm1730_vm0, %v1728_v13  ;;  %1685 = vmatpush3.bf16.msra.mxu0 (!%p225_p2), %v1713_v22  ;;  %vm530_vm0 = vcmask (!%p225_p2), 130048  }
   0x8   : > { %v326_v16 = vunpack.c.0.s8 (!%p225_p2), %v325_v15 }
   0x9   : > { %v1782_v3 = vsub.s32 (!%p225_p2), 0, %v1776_v1  ;;  %v1785_v4 = vsub.s32 (!%p225_p2), 2, %v1776_v1  ;;  %v1788_v5 = vsub.s32 (!%p225_p2), 1, %v1776_v1  ;;  %v1791_v6 = vsub.s32 (!%p225_p2), 3, %v1776_v1 }
   0xa   : > { %v1798_v11 = vsub.s32 (!%p225_p2), 4, %v1776_v1  ;;  %v1809_v17 = vsub.s32 (!%p225_p2), %v326_v16, %v1776_v1 }
   0xb   : > { %v290_v7 = vrot.slane (!%p225_p2), %v286_v2, %v1782_v3  ;;  %v304_v8 = vrot.slane (!%p225_p2), %v286_v2, %v1785_v4  ;;  %v297_v9 = vrot.slane (!%p225_p2), %v286_v2, %v1788_v5  ;;  %v311_v10 = vrot.slane (!%p225_p2), %v286_v2, %v1791_v6 }
   0xc   : > { %v318_v12 = vrot.slane (!%p225_p2), %v286_v2, %v1798_v11 }
   0xd   : > { %292 = vbcast.lane.b32.xlu0 %v290_v7, 256  ;;  %306 = vbcast.lane.b32.xlu1 %v304_v8, 256  ;;  %s2157_s22 = smov (!%p264_p3, %s1637_s22), 1 }
   0xe   : > { %s1642_s25 = sshll.u32 %s2157_s22, 3  ;;  %s270_s9 = scalar_lea.vmem %s2151_s2, %s2157_s22 }
   0xf   : > { %s267_s28 = scalar_lea.vmem %s2149_s0, %s1642_s25  ;;  %s283_s12 = scalar_lea.vmem %s2155_s6, %s2157_s22 }
  0x10   : > { %v285_v18 = vld [vmem:[%s267_s28] sm:$0x1f]  ;;  %s1680_s13 = sshll.u32 %s2157_s22, 7 }
  0x11   : > { %299 = vbcast.lane.b32.xlu0 %v297_v9, 256  ;;  %313 = vbcast.lane.b32.xlu1 %v311_v10, 256  ;;  %v330_v19 = vrot.slane %v285_v18, %v1809_v17  ;;  %v323_v21 = vcombine.high %v285_v18, %v285_v18  ;;  %s2022_s16 = scalar_lea.vmem %s2154_s5, %s1680_s13  ;;  %s2030_s19 = scalar_lea.vmem %s2153_s4, %s1680_s13 }
  0x13   : > { %v338_v20 = vcombine.high %v330_v19, %v330_v19  ;;  %v345_v23 = vrot.slane %v330_v19, %v1809_v17  ;;  %v337_v27 = vrot.slane %v323_v21, %v1809_v17 }
  0x15   : > { %320 = vbcast.lane.b32.xlu0 %v318_v12, 256  ;;  %v359_v24 = vrot.slane %v338_v20, %v1809_v17  ;;  %v360_v25 = vcombine.high %v345_v23, %v345_v23  ;;  %v365_v28 = vrot.slane %v345_v23, %v1782_v3  ;;  %v352_v34 = vrot.slane %v337_v27, %v1809_v17 }
  0x17   : > { %v361_v26 = vcombine.high %v359_v24, %v359_v24  ;;  %v373_v31 = vrot.slane %v360_v25, %v1782_v3  ;;  %v369_v32 = vrot.slane %v359_v24, %v1782_v3  ;;  %v381_v41 = vrot.slane %v352_v34, %v1782_v3 }
  0x19   : > { %v377_v33 = vrot.slane %v361_v26, %v1782_v3 }
  0x7f   : > { %v293_v29 = vpop.permute.xlu0 %292  ;;  %v307_v30 = vpop.permute.xlu1 %306 }
  0x80   : > { %v387_v35 = vmul.f32 %v365_v28, %v293_v29  ;;  %v389_v38 = vmul.f32 %v373_v31, %v307_v30 }
  0x82   : > { %v393_v42 = vsel %vm392_vm1, %v387_v35, 0.0  ;;  %v396_v46 = vsel %vm392_vm1, %v389_v38, 0.0 }
  0x83   : > { %v300_v36 = vpop.permute.xlu0 %299  ;;  %v314_v37 = vpop.permute.xlu1 %313 }
  0x84   : > { %v388_v39 = vmul.f32 %v369_v32, %v300_v36  ;;  %v390_v40 = vmul.f32 %v377_v33, %v314_v37 }
  0x86   : > { %v394_v43 = vsel %vm392_vm1, %v388_v39, 0.0  ;;  %v398_v47 = vsel %vm392_vm1, %v390_v40, 0.0 }
  0x87   : > { %v395_v44 = vadd.f32 %v394_v43, %v393_v42  ;;  %v321_v45 = vpop.permute.xlu0 %320 }
  0x88   : > { %v391_v48 = vmul.f32 %v381_v41, %v321_v45 }
  0x89   : > { %v397_v49 = vadd.f32 %v396_v46, %v395_v44 }
  0x8a   : > { %v400_v50 = vsel %vm392_vm1, %v391_v48, 0.0 }
  0x8b   : > { %v399_v51 = vadd.f32 %v398_v47, %v397_v49 }
  0x8d   : > { %v401_v52 = vadd.f32 %v400_v50, %v399_v51 }
  0x8f   : > { %v402_v53 = vsel %vm392_vm1, %v401_v52, -inf }
  0x90   : > { %v403_v54 = vrot.slane %v402_v53, 4 }
  0x92   : > { %v404_v55 = vmax.f32 %v402_v53, %v403_v54 }
  0x94   : > { %v405_v56 = vrot.slane %v404_v55, 2 }
  0x96   : > { %v406_v57 = vmax.f32 %v404_v55, %v405_v56 }
  0x98   : > { %v407_v58 = vrot.slane %v406_v57, 1 }
  0x9a   : > { %v408_v59 = vmax.f32 %v406_v57, %v407_v58  ;;  %v494_v58 = vld [vmem:[%s270_s9] sm:$0x1] }
  0x9c   : > { %v409_v60 = vsub.f32 %v401_v52, %v408_v59 }
  0x9e   : > { %v410_v61 = vmul.f32 1.442695, %v409_v60  ;;  %v506_v60 = vadd.s32 8, %v1776_v1 }
  0xa0   : > { %1714 = vpow2.f32 %v410_v61 }
  0xaa   : > { %v1715_v62 = vpop.eup %1714 }
  0xab   : > { %v412_v63 = vsel %vm392_vm1, %v1715_v62, 0.0 }
  0xac   : > { %v413_v2 = vrot.slane %v412_v63, 4 }
  0xae   : > { %v414_v7 = vadd.f32 %v413_v2, %v412_v63 }
  0xb0   : > { %v415_v8 = vrot.slane %v414_v7, 2 }
  0xb2   : > { %v416_v9 = vadd.f32 %v415_v8, %v414_v7 }
  0xb4   : > { %v417_v10 = vrot.slane %v416_v9, 1 }
  0xb6   : > { %v418_v12 = vadd.f32 %v417_v10, %v416_v9 }
  0xb8   : > { %1716 = vrcp.f32 %v418_v12 }
  0xc2   : > { %v1717_v14 = vpop.eup %1716 }
  0xc3   : > { %v420_v15 = vmul.f32 %v1717_v14, %v1715_v62 }
  0xc5   : > { %v479_v16 = vsel %vm392_vm1, %v420_v15, 0.0  ;;  %v423_v18 = vsel %vm392_vm1, %v420_v15, -inf }
  0xc6   : > { %480 = vadd.xlane.f32.xlu0 %v479_v16  ;;  %v424_v19 = vrot.slane %v423_v18, 4 }
  0xc8   : > { %v425_v20 = vmax.f32 %v423_v18, %v424_v19 }
  0xca   : > { %v426_v21 = vrot.slane %v425_v20, 2 }
  0xcc   : > { %v427_v22 = vmax.f32 %v425_v20, %v426_v21 }
  0xce   : > { %v428_v23 = vrot.slane %v427_v22, 1 }
  0xd0   : > { %v429_v24 = vmax.f32 %v427_v22, %v428_v23 }
  0xd2   : > { %vm430_vm2 = vcmp.eq.f32.partialorder %v420_v15, %v429_v24 }
  0xd3   : > { %v431_v25 = vsel %vm430_vm2, %v1776_v1, 5  ;;  %vm484_vm2 = vcmask 1044480  }
  0xd4   : > { %v432_v26 = vsel %vm392_vm1, %v431_v25, 2147483647 }
  0xd5   : > { %v433_v27 = vrot.slane %v432_v26, 4 }
  0xd7   : > { %vm434_vm3 = vcmp.lt.s32.totalorder %v432_v26, %v433_v27 }
  0xd8   : > { %v435_v28 = vsel %vm434_vm3, %v432_v26, %v433_v27  ;;  %vm492_vm3 = vcmask 0  }
  0xd9   : > { %v436_v29 = vrot.slane %v435_v28, 2 }
  0xdb   : > { %vm437_vm4 = vcmp.lt.s32.totalorder %v435_v28, %v436_v29 }
  0xdc   : > { %v438_v30 = vsel %vm437_vm4, %v435_v28, %v436_v29 }
  0xdd   : > { %v439_v31 = vrot.slane %v438_v30, 1 }
  0xdf   : > { %vm440_vm5 = vcmp.lt.s32.totalorder %v438_v30, %v439_v31 }
  0xe0   : > { %v441_v32 = vsel %vm440_vm5, %v438_v30, %v439_v31  ;;  %vm615_vm5 = vcmask 1042432  }
  0xe1   : > { %vm442_vm6 = vcmp.eq.s32.totalorder %v1776_v1, %v441_v32  ;;  %vm507_vm15 = vcmp.eq.s32.totalorder %v506_v60, %v441_v32 }
  0xe2   : > { %v1838_v33 = vsel %vm442_vm6, 1.0, %v1728_v13  ;;  %v1650_v12 = vsel %vm507_vm15, 1.0, %v1728_v13 }
  0xe3   : > { %v474_v34 = vsel %vm392_vm1, %v1838_v33, 0.0  ;;  %v445_v35 = vsub.f32 1.0, %v1838_v33 }
  0xe4   : > { %475 = vadd.xlane.f32.xlu0 %v474_v34 }
  0xe5   : > { %v446_v36 = vmul.f32 %v445_v35, %v420_v15 }
  0xe7   : > { %v447_v37 = vsel %vm392_vm1, %v446_v36, -inf }
  0xe8   : > { %v448_v38 = vrot.slane %v447_v37, 4 }
  0xea   : > { %v449_v39 = vmax.f32 %v447_v37, %v448_v38 }
  0xec   : > { %v450_v40 = vrot.slane %v449_v39, 2 }
  0xee   : > { %v451_v41 = vmax.f32 %v449_v39, %v450_v40 }
  0xf0   : > { %v452_v42 = vrot.slane %v451_v41, 1 }
  0xf2   : > { %v453_v43 = vmax.f32 %v451_v41, %v452_v42 }
  0xf4   : > { %vm454_vm7 = vcmp.eq.f32.partialorder %v446_v36, %v453_v43  ;;  %v469_v44 = vadd.f32 %v453_v43, %v429_v24 }
  0xf5   : > { %v455_v45 = vsel %vm454_vm7, %v1776_v1, 5 }
  0xf6   : > { %v470_v46 = vadd.f32 1e-09, %v469_v44  ;;  %v456_v47 = vsel %vm392_vm1, %v455_v45, 2147483647 }
  0xf7   : > { %v457_v48 = vrot.slane %v456_v47, 4 }
  0xf8   : > { %1718 = vrcp.f32 %v470_v46 }
  0xf9   : > { %vm458_vm8 = vcmp.lt.s32.totalorder %v456_v47, %v457_v48 }
  0xfa   : > { %v459_v49 = vsel %vm458_vm8, %v456_v47, %v457_v48 }
  0xfb   : > { %v460_v50 = vrot.slane %v459_v49, 2 }
  0xfd   : > { %vm461_vm9 = vcmp.lt.s32.totalorder %v459_v49, %v460_v50 }
  0xfe   : > { %v462_v51 = vsel %vm461_vm9, %v459_v49, %v460_v50 }
  0xff   : > { %v463_v52 = vrot.slane %v462_v51, 1 }
 0x101   : > { %vm464_vm10 = vcmp.lt.s32.totalorder %v462_v51, %v463_v52 }
 0x102   : > { %v1719_v53 = vpop.eup %1718  ;;  %v465_v54 = vsel %vm464_vm10, %v462_v51, %v463_v52 }
 0x103   : > { %v1850_v55 = vmul.f32 %v1719_v53, %v453_v43  ;;  %v510_v56 = vadd.s32 5, %v465_v54  ;;  %v1852_v57 = vmul.f32 %v1719_v53, %v429_v24  ;;  %vm466_vm14 = vcmp.eq.s32.totalorder %v1776_v1, %v465_v54 }
 0x104   : > { %v1863_v7 = vsel %vm466_vm14, 1.0, %v1728_v13  ;;  %v1731_v54 = vmov 0  }
 0x105   : > { %v495_v59 = vmul.f32 5.0, %v1850_v55  ;;  %vm511_vm12 = vcmp.eq.s32.totalorder %v1776_v1, %v510_v56  ;;  %vm512_vm13 = vcmp.eq.s32.totalorder %v506_v60, %v510_v56 }
 0x106   : > { %v1651_v63 = vsel %vm511_vm12, 1.0, %v1728_v13  ;;  %v1652_v2 = vsel %vm512_vm13, 1.0, %v1728_v13 }
 0x107   : > { %vm496_vm11 = vcmp.lt.f32.partialorder %v494_v58, %v495_v59 }
 0x108   : > { %v1649_v61 = vsel %vm496_vm11, 1.0, %v1728_v13  ;;  %vm1434_vm11 = vcmask 28672  }
 0x109   : > { %v503_v62 = vrot.slane %v1649_v61, %v1782_v3 }
 0x10b   : > { %v517_v8 = vmul.f32 %v1651_v63, %v503_v62  ;;  %v518_v9 = vmul.f32 %v1652_v2, %v503_v62  ;;  %v1866_v10 = vmul.f32 %v1863_v7, %v503_v62 }
 0x10d   : > { %v519_v14 = vadd.f32 %v1838_v33, %v517_v8  ;;  %v520_v15 = vadd.f32 %v1650_v12, %v518_v9  ;;  %v603_v12 = vrot.slane %v1866_v10, 3 }
 0x10f   : > { %v521_v16 = vpack.c.bf16 %v520_v15, %v519_v14 }
 0x111   : > { %1687 = vmatmul.mubr.msk.bf16.vlgmr.msra.gmra.mrb[0].mxu0 %vm530_vm0, %v521_v16 }
 0x153   : > { %v481_v18 = vpop.xlane.xlu0 %480 }
 0x154   : > { %v482_v20 = vmul.f32 0.0625, %v481_v18 }
 0x171   : > { %v476_v19 = vpop.xlane.xlu0 %475 }
 0x172   : > { %v478_v21 = vmul.f32 0.0625, %v476_v19 }
 0x174   : > { %v483_v22 = vmul.f32 %v482_v20, %v478_v21 }
 0x176   : > { %v485_v23 = vsel %vm484_vm2, %v483_v22, 0.0 }
 0x177   : > { %v486_v24 = vrot.slane %v485_v23, 4 }
 0x179   : > { %v487_v25 = vadd.f32 %v486_v24, %v485_v23 }
 0x17b   : > { %v488_v26 = vrot.slane %v487_v25, 2 }
 0x17d   : > { %v489_v27 = vadd.f32 %v488_v26, %v487_v25 }
 0x17f   : > { %v490_v28 = vrot.slane %v489_v27, 1 }
 0x181   : > { %v491_v29 = vadd.f32 %v490_v28, %v489_v27 }
 0x183   : > { %493 = vst.msk [vmem:[%s283_s12] sm:$0x1] %vm492_vm3, %v491_v29 }
 0x1e4   : > { %v568_v30 = vpop.f32.mrb[0].mxu0 }
 0x1e5   : > { %v575_v31 = vmul.f32 %v1838_v33, %v568_v30  ;;  %v1688_v32 = vpop.f32.mrb[1].mxu0 }
 0x1e6   : > { %v571_v34 = vpop.f32.mrb[2].mxu0 }
 0x1e7   : > { %vm576_vm4 = vcmp.lt.f32.partialorder %v575_v31, 4.0  ;;  %v589_v35 = vsel %vm392_vm1, %v575_v31, 0.0  ;;  %v1689_v36 = vpop.f32.mrb[3].mxu0 }
 0x1e8   : > { %v590_v37 = vrot.slane %v589_v35, 4  ;;  %v1655_v38 = vsel %vm576_vm4, 1.0, %v1728_v13 }
 0x1e9   : > { %v579_v39 = vmul.f32 %v1655_v38, %v1838_v33  ;;  %v1893_v38 = vsub.s32 5, %v1776_v1 }
 0x1ea   : > { %v591_v40 = vadd.f32 %v590_v37, %v589_v35 }
 0x1eb   : > { %v580_v41 = vsel %vm392_vm1, %v579_v39, 0.0  ;;  %v1898_v39 = vsub.s32 7, %v1776_v1 }
 0x1ec   : > { %581 = vadd.xlane.f32.xlu1 %v580_v41  ;;  %v583_v42 = vrot.slane %v580_v41, 4  ;;  %v592_v43 = vrot.slane %v591_v40, 2 }
 0x1ee   : > { %v584_v44 = vadd.f32 %v583_v42, %v580_v41  ;;  %v593_v45 = vadd.f32 %v592_v43, %v591_v40  ;;  %v1901_v40 = vsub.s32 6, %v1776_v1 }
 0x1f0   : > { %v585_v46 = vrot.slane %v584_v44, 2  ;;  %v594_v47 = vrot.slane %v593_v45, 1 }
 0x1f2   : > { %v586_v48 = vadd.f32 %v585_v46, %v584_v44  ;;  %v595_v49 = vadd.f32 %v594_v47, %v593_v45 }
 0x1f4   : > { %708 = vxpose.xlu0.b32.start.end [1/1] (short) (narrow) %v595_v49, 16  ;;  %v587_v50 = vrot.slane %v586_v48, 1 }
 0x1f6   : > { %v588_v51 = vadd.f32 %v587_v50, %v586_v48 }
 0x1f8   : > { %v596_v52 = vmul.f32 %v588_v51, %v1852_v57 }
 0x1fa   : > { %v642_v53 = vmul.f32 %v1838_v33, %v596_v52 }
 0x21d   : > { %1710 = vset.pattern.permute.xlu0 %v1731_v54 }
 0x21f   : > { %644 = vxpose.xlu1.b32.start.end [1/1] (short) (narrow) %v642_v53, 16 }
 0x23d   : > { %1711 = vset.pattern.permute.xlu1 %v1731_v54 }
 0x274   : > { %v724_v56 = vpop.trf.xlu0 }
 0x275   : > { %v1690_v58 = vtrunc.f32 %v724_v56 }
 0x277   : > { %v1691_v59 = vcvt.f32.s32 %v1690_v58 }
 0x278   : > { %v725_v60 = vpop.trf.xlu0 }
 0x279   : > { %v582_v61 = vpop.xlane.xlu1 %581  ;;  %779 = vperm.xlu0 %1710, %v1691_v59   ;;  %v1692_v62 = vtrunc.f32 %v725_v60  ;;  %v1915_v60 = vand.u32 127, %v287_v0 }
 0x27a   : > { %v598_v63 = vrot.slane %v582_v61, 3 }
 0x27b   : > { %v1693_v2 = vcvt.f32.s32 %v1692_v62 }
 0x27c   : > { %v600_v8 = vadd.f32 %v598_v63, %v568_v30  ;;  %v601_v9 = vadd.f32 %v598_v63, %v571_v34 }
 0x27d   : > { %782 = vperm.xlu1 %1711, %v1693_v2  }
 0x27e   : > { %v605_v57 = vmul.f32 %v603_v12, %v600_v8  ;;  %v606_v33 = vmul.f32 %v603_v12, %v601_v9 }
 0x280   : > { %vm607_vm6 = vcmp.lt.f32.partialorder %v605_v57, 4.0  ;;  %vm608_vm7 = vcmp.lt.f32.partialorder %v606_v33, 4.0  ;;  %v630_v14 = vrot.slane %v605_v57, 5  ;;  %v631_v15 = vrot.slane %v606_v33, 5 }
 0x281   : > { %v1656_v16 = vsel %vm607_vm6, 1.0, %v1728_v13  ;;  %v1657_v18 = vsel %vm608_vm7, 1.0, %v1728_v13 }
 0x282   : > { %v616_v19 = vrot.slane %v1656_v16, 5  ;;  %v617_v20 = vrot.slane %v1657_v18, 5  ;;  %v632_v21 = vsel %vm615_vm5, %v630_v14, %v631_v15 }
 0x283   : > { %v634_v51 = vsel %vm392_vm1, %v632_v21, 0.0 }
 0x284   : > { %v618_v22 = vsel %vm615_vm5, %v616_v19, %v617_v20  ;;  %v635_v52 = vrot.slane %v634_v51, 4 }
 0x285   : > { %v620_v23 = vmul.f32 %v618_v22, %v1866_v10 }
 0x286   : > { %v636_v53 = vadd.f32 %v635_v52, %v634_v51 }
 0x287   : > { %v621_v24 = vsel %vm392_vm1, %v620_v23, 0.0 }
 0x288   : > { %v622_v25 = vrot.slane %v621_v24, 4  ;;  %v637_v54 = vrot.slane %v636_v53, 2 }
 0x28a   : > { %v623_v26 = vadd.f32 %v622_v25, %v621_v24  ;;  %v638_v56 = vadd.f32 %v637_v54, %v636_v53 }
 0x28c   : > { %v624_v27 = vrot.slane %v623_v26, 2  ;;  %v639_v58 = vrot.slane %v638_v56, 1 }
 0x28e   : > { %v625_v28 = vadd.f32 %v624_v27, %v623_v26  ;;  %v640_v59 = vadd.f32 %v639_v58, %v638_v56 }
 0x290   : > { %v626_v29 = vrot.slane %v625_v28, 1 }
 0x292   : > { %v627_v30 = vadd.f32 %v626_v29, %v625_v28 }
 0x294   : > { %v641_v31 = vmul.f32 %v627_v30, %v1850_v55 }
 0x296   : > { %v643_v32 = vmul.f32 %v1863_v7, %v641_v31 }
 0x29f   : > { %v660_v34 = vpop.trf.xlu1 }
 0x2a0   : > { %v812_v35 = vrot.slane %v660_v34, %v1788_v5  ;;  %v805_v36 = vrot.slane %v660_v34, %v1782_v3  ;;  %v826_v10 = vrot.slane %v660_v34, %v1791_v6  ;;  %v819_v37 = vrot.slane %v660_v34, %v1785_v4 }
 0x2a1   : > { %v840_v55 = vrot.slane %v660_v34, %v1893_v38  ;;  %v833_v7 = vrot.slane %v660_v34, %v1798_v11  ;;  %v854_v42 = vrot.slane %v660_v34, %v1898_v39  ;;  %v847_v43 = vrot.slane %v660_v34, %v1901_v40 }
 0x2a2   : > { %814 = vbcast.lane.b32.xlu1 %v812_v35, 256  ;;  %807 = vbcast.lane.b32.xlu0 %v805_v36, 256 }
 0x2a3   : > { %v661_v41 = vpop.trf.xlu1 }
 0x2a4   : > { %v868_v44 = vrot.slane %v661_v41, %v1788_v5  ;;  %v861_v45 = vrot.slane %v661_v41, %v1782_v3  ;;  %v882_v46 = vrot.slane %v661_v41, %v1791_v6  ;;  %v875_v1 = vrot.slane %v661_v41, %v1785_v4 }
 0x2a5   : > { %v896_v47 = vrot.slane %v661_v41, %v1893_v38  ;;  %v889_v48 = vrot.slane %v661_v41, %v1798_v11  ;;  %v910_v49 = vrot.slane %v661_v41, %v1898_v39  ;;  %v903_v50 = vrot.slane %v661_v41, %v1901_v40 }
 0x2a6   : > { %828 = vbcast.lane.b32.xlu1 %v826_v10, 256  ;;  %821 = vbcast.lane.b32.xlu0 %v819_v37, 256 }
 0x2aa   : > { %842 = vbcast.lane.b32.xlu1 %v840_v55, 256  ;;  %835 = vbcast.lane.b32.xlu0 %v833_v7, 256 }
 0x2ae   : > { %856 = vbcast.lane.b32.xlu1 %v854_v42, 256  ;;  %849 = vbcast.lane.b32.xlu0 %v847_v43, 256 }
 0x2b2   : > { %870 = vbcast.lane.b32.xlu1 %v868_v44, 256  ;;  %863 = vbcast.lane.b32.xlu0 %v861_v45, 256 }
 0x2b6   : > { %884 = vbcast.lane.b32.xlu1 %v882_v46, 256  ;;  %877 = vbcast.lane.b32.xlu0 %v875_v1, 256 }
 0x2ba   : > { %898 = vbcast.lane.b32.xlu1 %v896_v47, 256  ;;  %891 = vbcast.lane.b32.xlu0 %v889_v48, 256 }
 0x2be   : > { %912 = vbcast.lane.b32.xlu1 %v910_v49, 256  ;;  %905 = vbcast.lane.b32.xlu0 %v903_v50, 256 }
 0x2dc   : > { %742 = vxpose.xlu0.b32.start.end [1/1] (short) (narrow) %v640_v59, 16 }
 0x2e7   : > { %676 = vxpose.xlu1.b32.start.end [1/1] (short) (narrow) %v643_v32, 16 }
 0x2f8   : > { %v780_v61 = vpop.permute.xlu0 %779 }
 0x2f9   : > { %vm784_vm8 = vcmp.eq.s32.totalorder %v780_v61, %v1915_v60 }
 0x2fa   : > { %v1658_v62 = vsel %vm784_vm8, 1.0, %v1728_v13 }
 0x2fb   : > { %v923_v63 = vrot.slane %v1658_v62, %v1809_v17  ;;  %v916_v2 = vcombine.high %v1658_v62, %v1658_v62 }
 0x2fc   : > { %v783_v9 = vpop.permute.xlu1 %782 }
 0x2fd   : > { %v931_v8 = vcombine.high %v923_v63, %v923_v63  ;;  %v930_v12 = vrot.slane %v916_v2, %v1809_v17  ;;  %vm785_vm1 = vcmp.eq.s32.totalorder %v783_v9, %v1915_v60  ;;  %v939_v57 = vrot.slane %v923_v63, %v1809_v17 }
 0x2fe   : > { %v1659_v0 = vsel %vm785_vm1, 1.0, %v1728_v13 }
 0x2ff   : > { %v953_v33 = vrot.slane %v931_v8, %v1809_v17  ;;  %v961_v14 = vcombine.high %v939_v57, %v939_v57  ;;  %v1017_v15 = vrot.slane %v939_v57, %v1782_v3  ;;  %v932_v19 = vcombine.high %v930_v12, %v930_v12 }
 0x300   : > { %v972_v20 = vrot.slane %v1659_v0, %v1809_v17  ;;  %v946_v24 = vrot.slane %v930_v12, %v1809_v17  ;;  %v965_v29 = vcombine.high %v1659_v0, %v1659_v0 }
 0x301   : > { %v1021_v16 = vrot.slane %v953_v33, %v1782_v3  ;;  %v963_v18 = vcombine.high %v953_v33, %v953_v33  ;;  %v1025_v23 = vrot.slane %v961_v14, %v1782_v3  ;;  %v960_v28 = vrot.slane %v932_v19, %v1809_v17 }
 0x302   : > { %v980_v30 = vcombine.high %v972_v20, %v972_v20  ;;  %v1033_v34 = vrot.slane %v946_v24, %v1782_v3  ;;  %v962_v35 = vcombine.high %v946_v24, %v946_v24  ;;  %v979_v7 = vrot.slane %v965_v29, %v1809_v17 }
 0x303   : > { %v1029_v27 = vrot.slane %v963_v18, %v1782_v3  ;;  %v1037_v37 = vrot.slane %v960_v28, %v1782_v3  ;;  %v964_v55 = vcombine.high %v960_v28, %v960_v28  ;;  %v988_v43 = vrot.slane %v972_v20, %v1809_v17 }
 0x304   : > { %v1002_v44 = vrot.slane %v980_v30, %v1809_v17  ;;  %v1041_v1 = vrot.slane %v962_v35, %v1782_v3  ;;  %v981_v52 = vcombine.high %v979_v7, %v979_v7  ;;  %v995_v62 = vrot.slane %v979_v7, %v1809_v17 }
 0x305   : > { %v1045_v47 = vrot.slane %v964_v55, %v1782_v3  ;;  %v1049_v50 = vrot.slane %v988_v43, %v1782_v3  ;;  %v1010_v56 = vcombine.high %v988_v43, %v988_v43 }
 0x306   : > { %v1053_v51 = vrot.slane %v1002_v44, %v1782_v3  ;;  %v1012_v58 = vcombine.high %v1002_v44, %v1002_v44  ;;  %v1009_v63 = vrot.slane %v981_v52, %v1809_v17  ;;  %v1065_v0 = vrot.slane %v995_v62, %v1782_v3 }
 0x307   : > { %v1057_v9 = vrot.slane %v1010_v56, %v1782_v3  ;;  %v1011_v14 = vcombine.high %v995_v62, %v995_v62 }
 0x308   : > { %v1061_v12 = vrot.slane %v1012_v58, %v1782_v3  ;;  %v1069_v18 = vrot.slane %v1009_v63, %v1782_v3  ;;  %v1013_v19 = vcombine.high %v1009_v63, %v1009_v63 }
 0x309   : > { %v1073_v24 = vrot.slane %v1011_v14, %v1782_v3 }
 0x314   : > { %v808_v21 = vpop.permute.xlu0 %807  ;;  %v815_v22 = vpop.permute.xlu1 %814 }
 0x315   : > { %v1930_v25 = vmul.f32 %v1017_v15, %v808_v21  ;;  %v1932_v26 = vmul.f32 %v1021_v16, %v815_v22 }
 0x318   : > { %v822_v31 = vpop.permute.xlu0 %821  ;;  %v829_v32 = vpop.permute.xlu1 %828 }
 0x319   : > { %v1937_v36 = vmul.f32 %v1025_v23, %v822_v31  ;;  %v1939_v10 = vmul.f32 %v1029_v27, %v829_v32  ;;  %v1077_v27 = vrot.slane %v1013_v19, %v1782_v3 }
 0x31c   : > { %v836_v41 = vpop.permute.xlu0 %835  ;;  %v843_v42 = vpop.permute.xlu1 %842 }
 0x31d   : > { %v1945_v45 = vmul.f32 %v1033_v34, %v836_v41  ;;  %v1947_v46 = vmul.f32 %v1037_v37, %v843_v42 }
 0x320   : > { %v850_v48 = vpop.permute.xlu0 %849  ;;  %v857_v49 = vpop.permute.xlu1 %856 }
 0x321   : > { %v1953_v53 = vmul.f32 %v1041_v1, %v850_v48  ;;  %v1955_v54 = vmul.f32 %v1045_v47, %v857_v49 }
 0x324   : > { %v864_v59 = vpop.permute.xlu0 %863  ;;  %v871_v61 = vpop.permute.xlu1 %870 }
 0x325   : > { %v1959_v2 = vmul.f32 %v1049_v50, %v864_v59  ;;  %v1961_v8 = vmul.f32 %v1053_v51, %v871_v61 }
 0x328   : > { %v878_v57 = vpop.permute.xlu0 %877  ;;  %v885_v33 = vpop.permute.xlu1 %884 }
 0x329   : > { %v1966_v15 = vmul.f32 %v1057_v9, %v878_v57  ;;  %v1968_v16 = vmul.f32 %v1061_v12, %v885_v33 }
 0x32c   : > { %v892_v20 = vpop.permute.xlu0 %891  ;;  %v899_v21 = vpop.permute.xlu1 %898 }
 0x32d   : > { %v1971_v22 = vmul.f32 %v1065_v0, %v892_v20  ;;  %v1973_v23 = vmul.f32 %v1069_v18, %v899_v21 }
 0x330   : > { %v906_v28 = vpop.permute.xlu0 %905  ;;  %v913_v29 = vpop.permute.xlu1 %912 }
 0x331   : > { %v1977_v30 = vmul.f32 %v1073_v24, %v906_v28  ;;  %v1979_v31 = vmul.f32 %v1077_v27, %v913_v29 }
 0x35c   : > { %v758_v32 = vpop.trf.xlu0 }
 0x35d   : > { %v1694_v34 = vtrunc.f32 %v758_v32 }
 0x35f   : > { %v1695_v35 = vcvt.f32.s32 %v1694_v34 }
 0x360   : > { %v759_v37 = vpop.trf.xlu0 }
 0x361   : > { %v1696_v55 = vtrunc.f32 %v759_v37  ;;  %791 = vperm.xlu1 %1711, %v1695_v35  }
 0x363   : > { %v1697_v7 = vcvt.f32.s32 %v1696_v55 }
 0x365   : > { %794 = vperm.xlu1 %1711, %v1697_v7  }
 0x367   : > { %v692_v41 = vpop.trf.xlu1 }
 0x368   : > { %v1120_v42 = vrot.slane %v692_v41, %v1788_v5  ;;  %v1113_v43 = vrot.slane %v692_v41, %v1782_v3  ;;  %v1134_v44 = vrot.slane %v692_v41, %v1791_v6  ;;  %v1127_v1 = vrot.slane %v692_v41, %v1785_v4 }
 0x369   : > { %v1148_v47 = vrot.slane %v692_v41, %v1893_v38  ;;  %v1141_v48 = vrot.slane %v692_v41, %v1798_v11  ;;  %v1162_v49 = vrot.slane %v692_v41, %v1898_v39  ;;  %v1155_v50 = vrot.slane %v692_v41, %v1901_v40 }
 0x36a   : > { %1122 = vbcast.lane.b32.xlu1 %v1120_v42, 256  ;;  %1115 = vbcast.lane.b32.xlu0 %v1113_v43, 256 }
 0x36b   : > { %v693_v51 = vpop.trf.xlu1 }
 0x36c   : > { %v1176_v52 = vrot.slane %v693_v51, %v1788_v5  ;;  %v1169_v56 = vrot.slane %v693_v51, %v1782_v3  ;;  %v1190_v58 = vrot.slane %v693_v51, %v1791_v6  ;;  %v1183_v59 = vrot.slane %v693_v51, %v1785_v4 }
 0x36d   : > { %v1204_v61 = vrot.slane %v693_v51, %v1893_v38  ;;  %v1197_v62 = vrot.slane %v693_v51, %v1798_v11  ;;  %v1218_v63 = vrot.slane %v693_v51, %v1898_v39  ;;  %v1211_v5 = vrot.slane %v693_v51, %v1901_v40 }
 0x36e   : > { %1136 = vbcast.lane.b32.xlu1 %v1134_v44, 256  ;;  %1129 = vbcast.lane.b32.xlu0 %v1127_v1, 256 }
 0x372   : > { %1150 = vbcast.lane.b32.xlu1 %v1148_v47, 256  ;;  %1143 = vbcast.lane.b32.xlu0 %v1141_v48, 256 }
 0x376   : > { %1164 = vbcast.lane.b32.xlu1 %v1162_v49, 256  ;;  %1157 = vbcast.lane.b32.xlu0 %v1155_v50, 256 }
 0x37a   : > { %1178 = vbcast.lane.b32.xlu1 %v1176_v52, 256  ;;  %1171 = vbcast.lane.b32.xlu0 %v1169_v56, 256 }
 0x37e   : > { %1192 = vbcast.lane.b32.xlu1 %v1190_v58, 256  ;;  %1185 = vbcast.lane.b32.xlu0 %v1183_v59, 256 }
 0x382   : > { %1206 = vbcast.lane.b32.xlu1 %v1204_v61, 256  ;;  %1199 = vbcast.lane.b32.xlu0 %v1197_v62, 256 }
 0x386   : > { %1220 = vbcast.lane.b32.xlu1 %v1218_v63, 256  ;;  %1213 = vbcast.lane.b32.xlu0 %v1211_v5, 256 }
 0x3dc   : > { %v1116_v9 = vpop.permute.xlu0 %1115 }
 0x3e0   : > { %v1130_v12 = vpop.permute.xlu0 %1129  ;;  %v792_v6 = vpop.permute.xlu1 %791 }
 0x3e1   : > { %vm796_vm9 = vcmp.eq.s32.totalorder %v792_v6, %v1915_v60 }
 0x3e2   : > { %v1660_v4 = vsel %vm796_vm9, 1.0, %v1728_v13 }
 0x3e3   : > { %v1224_v57 = vcombine.high %v1660_v4, %v1660_v4  ;;  %v1231_v38 = vrot.slane %v1660_v4, %v1809_v17 }
 0x3e4   : > { %v1144_v11 = vpop.permute.xlu0 %1143  ;;  %v795_v33 = vpop.permute.xlu1 %794 }
 0x3e5   : > { %v2001_v0 = vrot.slane %v1224_v57, %v1809_v17  ;;  %v1239_v39 = vcombine.high %v1231_v38, %v1231_v38  ;;  %v1247_v40 = vrot.slane %v1231_v38, %v1809_v17  ;;  %vm797_vm10 = vcmp.eq.s32.totalorder %v795_v33, %v1915_v60 }
 0x3e6   : > { %v1661_v14 = vsel %vm797_vm10, 1.0, %v1728_v13 }
 0x3e7   : > { %v1269_v18 = vcombine.high %v1247_v40, %v1247_v40  ;;  %v1325_v19 = vrot.slane %v1247_v40, %v1782_v3  ;;  %v1254_v20 = vrot.slane %v2001_v0, %v1809_v17  ;;  %v1273_v21 = vcombine.high %v1661_v14, %v1661_v14 }
 0x3e8   : > { %v1280_v24 = vrot.slane %v1661_v14, %v1809_v17  ;;  %v1158_v27 = vpop.permute.xlu0 %1157  ;;  %v1261_v28 = vrot.slane %v1239_v39, %v1809_v17  ;;  %v1123_v29 = vpop.permute.xlu1 %1122  ;;  %v1240_v60 = vcombine.high %v2001_v0, %v2001_v0 }
 0x3e9   : > { %v1333_v32 = vrot.slane %v1269_v18, %v1782_v3  ;;  %v1402_v34 = vmul.f32 %v1325_v19, %v1116_v9  ;;  %v1341_v35 = vrot.slane %v1254_v20, %v1782_v3  ;;  %v2017_v37 = vrot.slane %v1273_v21, %v1809_v17 }
 0x3ea   : > { %v1288_v55 = vcombine.high %v1280_v24, %v1280_v24  ;;  %v1270_v7 = vcombine.high %v1254_v20, %v1254_v20  ;;  %v1329_v41 = vrot.slane %v1261_v28, %v1782_v3  ;;  %v1296_v42 = vrot.slane %v1280_v24, %v1809_v17 }
 0x3eb   : > { %v1404_v43 = vmul.f32 %v1333_v32, %v1130_v12  ;;  %v1418_v44 = vadd.f32 %v1402_v34, %v1930_v25  ;;  %v1406_v1 = vmul.f32 %v1341_v35, %v1144_v11  ;;  %v1271_v47 = vcombine.high %v1261_v28, %v1261_v28 }
 0x3ec   : > { %v1349_v48 = vrot.slane %v1270_v7, %v1782_v3  ;;  %v1403_v49 = vmul.f32 %v1329_v41, %v1123_v29  ;;  %v1172_v50 = vpop.permute.xlu0 %1171  ;;  %v1357_v51 = vrot.slane %v1296_v42, %v1782_v3  ;;  %v1137_v52 = vpop.permute.xlu1 %1136  ;;  %v1318_v56 = vcombine.high %v1296_v42, %v1296_v42 }
 0x3ed   : > { %v1420_v25 = vadd.f32 %v1404_v43, %v1937_v36  ;;  %1435 = vst.msk [vmem:[%s2022_s16] sm:$0x1f] %vm1434_vm11, %v1418_v44  ;;  %vm1451_vm12 = vcmp.ne.f32.partialorder %v1418_v44, 0.0  ;;  %v1422_v58 = vadd.f32 %v1406_v1, %v1945_v45  ;;  %v1337_v59 = vrot.slane %v1271_v47, %v1782_v3 }
 0x3ee   : > { %v1662_v61 = vsel %vm1451_vm12, 1.0, %v1728_v13  ;;  %v1408_v62 = vmul.f32 %v1349_v48, %v1158_v27  ;;  %v1419_v63 = vadd.f32 %v1403_v49, %v1932_v26  ;;  %v1410_v5 = vmul.f32 %v1357_v51, %v1172_v50 }
 0x3ef   : > { %1437 = vst.msk [vmem:[%s2022_s16 + $0x10] sm:$0x1f] %vm1434_vm11, %v1420_v25  ;;  %vm1453_vm13 = vcmp.ne.f32.partialorder %v1420_v25, 0.0  ;;  %1499 = vst.msk [vmem:[%s2030_s19] sm:$0x1f] %vm1434_vm11, %v1662_v61  ;;  %vm1455_vm14 = vcmp.ne.f32.partialorder %v1422_v58, 0.0  ;;  %v1405_v36 = vmul.f32 %v1337_v59, %v1137_v52  ;;  %v1365_v45 = vrot.slane %v1318_v56, %v1782_v3 }
 0x3f0   : > { %1439 = vst.msk [vmem:[%s2022_s16 + $0x20] sm:$0x1f] %vm1434_vm11, %v1422_v58  ;;  %v1664_v9 = vsel %vm1453_vm13, 1.0, %v1728_v13  ;;  %v1666_v26 = vsel %vm1455_vm14, 1.0, %v1728_v13  ;;  %v1424_v12 = vadd.f32 %v1408_v62, %v1953_v53  ;;  %1436 = vst.msk [vmem:[%s2022_s16 + $0x8] sm:$0x1f] %vm1434_vm11, %v1419_v63  ;;  %v1186_v6 = vpop.permute.xlu0 %1185  ;;  %v1151_v4 = vpop.permute.xlu1 %1150  ;;  %v1426_v38 = vadd.f32 %v1410_v5, %v1959_v2 }
 0x3f1   : > { %vm1452_vm15 = vcmp.ne.f32.partialorder %v1419_v63, 0.0  ;;  %1501 = vst.msk [vmem:[%s2030_s19 + $0x10] sm:$0x1f] %vm1434_vm11, %v1664_v9  ;;  %1503 = vst.msk [vmem:[%s2030_s19 + $0x20] sm:$0x1f] %vm1434_vm11, %v1666_v26  ;;  %v1421_v11 = vadd.f32 %v1405_v36, %v1939_v10  ;;  %v1412_v33 = vmul.f32 %v1365_v45, %v1186_v6  ;;  %v1268_v53 = vrot.slane %v1240_v60, %v1809_v17 }
 0x3f2   : > { %v1663_v57 = vsel %vm1452_vm15, 1.0, %v1728_v13  ;;  %1441 = vst.msk [vmem:[%s2022_s16 + $0x30] sm:$0x1f] %vm1434_vm11, %v1424_v12  ;;  %vm1457_vm0 = vcmp.ne.f32.partialorder %v1424_v12, 0.0  ;;  %v1303_v0 = vrot.slane %v2017_v37, %v1809_v17  ;;  %v1310_v39 = vrot.slane %v1288_v55, %v1809_v17  ;;  %1443 = vst.msk [vmem:[%s2022_s16 + $0x40] sm:$0x1f] %vm1434_vm11, %v1426_v38 }
 0x3f3   : > { %1500 = vst.msk [vmem:[%s2030_s19 + $0x8] sm:$0x1f] %vm1434_vm11, %v1663_v57  ;;  %v1668_v2 = vsel %vm1457_vm0, 1.0, %v1728_v13  ;;  %vm1459_vm2 = vcmp.ne.f32.partialorder %v1426_v38, 0.0  ;;  %1438 = vst.msk [vmem:[%s2022_s16 + $0x18] sm:$0x1f] %vm1434_vm11, %v1421_v11  ;;  %v1428_v10 = vadd.f32 %v1412_v33, %v1966_v15  ;;  %v1345_v18 = vrot.slane %v1268_v53, %v1782_v3 }
 0x3f4   : > { %vm1454_vm3 = vcmp.ne.f32.partialorder %v1421_v11, 0.0  ;;  %1505 = vst.msk [vmem:[%s2030_s19 + $0x30] sm:$0x1f] %vm1434_vm11, %v1668_v2  ;;  %v1670_v40 = vsel %vm1459_vm2, 1.0, %v1728_v13  ;;  %v1200_v19 = vpop.permute.xlu0 %1199  ;;  %v1373_v20 = vrot.slane %v1303_v0, %v1782_v3  ;;  %v1165_v21 = vpop.permute.xlu1 %1164  ;;  %v1272_v15 = vcombine.high %v1268_v53, %v1268_v53 }
 0x3f5   : > { %v1665_v14 = vsel %vm1454_vm3, 1.0, %v1728_v13  ;;  %1507 = vst.msk [vmem:[%s2030_s19 + $0x40] sm:$0x1f] %vm1434_vm11, %v1670_v40  ;;  %1445 = vst.msk [vmem:[%s2022_s16 + $0x50] sm:$0x1f] %vm1434_vm11, %v1428_v10  ;;  %vm1461_vm4 = vcmp.ne.f32.partialorder %v1428_v10, 0.0  ;;  %v1319_v24 = vcombine.high %v1303_v0, %v1303_v0  ;;  %v1407_v28 = vmul.f32 %v1345_v18, %v1151_v4 }
 0x3f6   : > { %1502 = vst.msk [vmem:[%s2030_s19 + $0x18] sm:$0x1f] %vm1434_vm11, %v1665_v14  ;;  %v1672_v27 = vsel %vm1461_vm4, 1.0, %v1728_v13  ;;  %v1414_v29 = vmul.f32 %v1373_v20, %v1200_v19  ;;  %v1320_v60 = vcombine.high %v1310_v39, %v1310_v39  ;;  %v1353_v32 = vrot.slane %v1272_v15, %v1782_v3 }
 0x3f7   : > { %1509 = vst.msk [vmem:[%s2030_s19 + $0x50] sm:$0x1f] %vm1434_vm11, %v1672_v27  ;;  %v1381_v34 = vrot.slane %v1319_v24, %v1782_v3  ;;  %v1361_v35 = vrot.slane %v1310_v39, %v1782_v3  ;;  %v1289_v55 = vcombine.high %v2017_v37, %v2017_v37  ;;  %v1423_v7 = vadd.f32 %v1407_v28, %v1947_v46 }
 0x3f8   : > { %v1430_v41 = vadd.f32 %v1414_v29, %v1971_v22  ;;  %v1214_v42 = vpop.permute.xlu0 %1213  ;;  %v1179_v43 = vpop.permute.xlu1 %1178  ;;  %v1409_v44 = vmul.f32 %v1353_v32, %v1165_v21  ;;  %v1369_v37 = vrot.slane %v1320_v60, %v1782_v3 }
 0x3f9   : > { %v1416_v1 = vmul.f32 %v1381_v34, %v1214_v42  ;;  %v1411_v47 = vmul.f32 %v1361_v35, %v1179_v43  ;;  %1440 = vst.msk [vmem:[%s2022_s16 + $0x28] sm:$0x1f] %vm1434_vm11, %v1423_v7  ;;  %vm1456_vm5 = vcmp.ne.f32.partialorder %v1423_v7, 0.0  ;;  %v1317_v46 = vrot.slane %v1289_v55, %v1809_v17 }
 0x3fa   : > { %1447 = vst.msk [vmem:[%s2022_s16 + $0x60] sm:$0x1f] %vm1434_vm11, %v1430_v41  ;;  %vm1463_vm6 = vcmp.ne.f32.partialorder %v1430_v41, 0.0  ;;  %v1667_v22 = vsel %vm1456_vm5, 1.0, %v1728_v13  ;;  %v1425_v49 = vadd.f32 %v1409_v44, %v1955_v54 }
 0x3fb   : > { %v1674_v48 = vsel %vm1463_vm6, 1.0, %v1728_v13  ;;  %v1432_v50 = vadd.f32 %v1416_v1, %v1977_v30  ;;  %1504 = vst.msk [vmem:[%s2030_s19 + $0x28] sm:$0x1f] %vm1434_vm11, %v1667_v22  ;;  %v1427_v51 = vadd.f32 %v1411_v47, %v1961_v8  ;;  %v1377_v25 = vrot.slane %v1317_v46, %v1782_v3 }
 0x3fc   : > { %1511 = vst.msk [vmem:[%s2030_s19 + $0x60] sm:$0x1f] %vm1434_vm11, %v1674_v48  ;;  %v1193_v52 = vpop.permute.xlu1 %1192  ;;  %1442 = vst.msk [vmem:[%s2022_s16 + $0x38] sm:$0x1f] %vm1434_vm11, %v1425_v49  ;;  %vm1458_vm7 = vcmp.ne.f32.partialorder %v1425_v49, 0.0  ;;  %v1321_v58 = vcombine.high %v1317_v46, %v1317_v46 }
 0x3fd   : > { %1449 = vst.msk [vmem:[%s2022_s16 + $0x70] sm:$0x1f] %vm1434_vm11, %v1432_v50  ;;  %vm1465_vm8 = vcmp.ne.f32.partialorder %v1432_v50, 0.0  ;;  %v1413_v17 = vmul.f32 %v1369_v37, %v1193_v52  ;;  %v1669_v54 = vsel %vm1458_vm7, 1.0, %v1728_v13  ;;  %1444 = vst.msk [vmem:[%s2022_s16 + $0x48] sm:$0x1f] %vm1434_vm11, %v1427_v51 }
 0x3fe   : > { %v1676_v30 = vsel %vm1465_vm8, 1.0, %v1728_v13  ;;  %vm1460_vm1 = vcmp.ne.f32.partialorder %v1427_v51, 0.0  ;;  %1506 = vst.msk [vmem:[%s2030_s19 + $0x38] sm:$0x1f] %vm1434_vm11, %v1669_v54 }
 0x3ff   : > { %1513 = vst.msk [vmem:[%s2030_s19 + $0x70] sm:$0x1f] %vm1434_vm11, %v1676_v30  ;;  %v1671_v8 = vsel %vm1460_vm1, 1.0, %v1728_v13  ;;  %v1429_v56 = vadd.f32 %v1413_v17, %v1968_v16  ;;  %v1385_v16 = vrot.slane %v1321_v58, %v1782_v3 }
 0x400   : > { %1508 = vst.msk [vmem:[%s2030_s19 + $0x48] sm:$0x1f] %vm1434_vm11, %v1671_v8  ;;  %v1207_v59 = vpop.permute.xlu1 %1206 }
 0x401   : > { %1446 = vst.msk [vmem:[%s2022_s16 + $0x58] sm:$0x1f] %vm1434_vm11, %v1429_v56  ;;  %vm1462_vm9 = vcmp.ne.f32.partialorder %v1429_v56, 0.0  ;;  %v1415_v61 = vmul.f32 %v1377_v25, %v1207_v59 }
 0x402   : > { %v1673_v62 = vsel %vm1462_vm9, 1.0, %v1728_v13 }
 0x403   : > { %1510 = vst.msk [vmem:[%s2030_s19 + $0x58] sm:$0x1f] %vm1434_vm11, %v1673_v62  ;;  %v1431_v63 = vadd.f32 %v1415_v61, %v1973_v23 }
 0x404   : > { %v1221_v5 = vpop.permute.xlu1 %1220 }
 0x405   : > { %1448 = vst.msk [vmem:[%s2022_s16 + $0x68] sm:$0x1f] %vm1434_vm11, %v1431_v63  ;;  %vm1464_vm10 = vcmp.ne.f32.partialorder %v1431_v63, 0.0  ;;  %v1417_v36 = vmul.f32 %v1385_v16, %v1221_v5 }
 0x406   : > { %v1675_v45 = vsel %vm1464_vm10, 1.0, %v1728_v13 }
 0x407   : > { %1512 = vst.msk [vmem:[%s2030_s19 + $0x68] sm:$0x1f] %vm1434_vm11, %v1675_v45  ;;  %v1433_v9 = vadd.f32 %v1417_v36, %v1979_v31 }
 0x409   : > { %1450 = vst.msk [vmem:[%s2022_s16 + $0x78] sm:$0x1f] %vm1434_vm11, %v1433_v9  ;;  %vm1466_vm12 = vcmp.ne.f32.partialorder %v1433_v9, 0.0 }
 0x40a   : > { %v1677_v26 = vsel %vm1466_vm12, 1.0, %v1728_v13 }
 0x40b   : > { %1514 = vst.msk [vmem:[%s2030_s19 + $0x78] sm:$0x1f] %vm1434_vm11, %v1677_v26 }
 0x40c PF: > { %s17_s21 = sadd.s32 1, %s1726_s21  }
 0x40d   : > { %p14_p4 = scmp.ge.s32.totalorder %s17_s21, 4  }
 0x40f   :  { %16 = sbr.rel (!%p14_p4) target bundleno = 1 (0x1), region = 93 }

</bundles_post_ra>
